<compile_context>
chip_gen: v7x
topology: tpu7x:2x2x1
jax: 0.10.0
libtpu: 0.0.40
codegen_flags: <defaults>
</compile_context>

<pallas_src>
import functools

import jax
import jax.numpy as jnp
from jax.experimental import pallas as pl
from jax.experimental.pallas import tpu as pltpu


def _policy_mean_t_kernel(xT_ref, w1T_ref, b1_ref, w2T_ref, b2_ref, meanT_ref):
    """One batch tile of the policy-mean MLP, batch-in-lanes (transposed) layout.

    xT:   (S, TB)  compute dtype      w1T: (H, S) compute dtype
    b1:   (H, 1)   f32                w2T: (A, H) compute dtype
    b2:   (A, 1)   f32                meanT: (A, TB) f32
    """
    # Hidden layer: MXU matmul (bf16 or f32 operands), fp32 accumulate,
    # fp32 bias-add (VPU) + tanh (EUP).
    h = jnp.dot(w1T_ref[...], xT_ref[...], preferred_element_type=jnp.float32)
    h = jnp.tanh(h + b1_ref[...])
    # Output layer: cast activations back to the matmul dtype, fp32 accumulate.
    out = jnp.dot(w2T_ref[...], h.astype(w2T_ref.dtype),
                  preferred_element_type=jnp.float32)
    meanT_ref[...] = (out + b2_ref[...]).astype(meanT_ref.dtype)


def _round_up(x, m):
    return (x + m - 1) // m * m


def _default_compute_dtype():
    """bf16 on v6e/v7x (halves dominant HBM traffic); f32 on v5e (free there,
    keeps fp32 parity with the PyTorch module)."""
    try:
        kind = jax.devices()[0].device_kind.lower()
    except Exception:
        return jnp.bfloat16
    if "v5 lite" in kind or "v5e" in kind or "v5lite" in kind:
        return jnp.float32
    return jnp.bfloat16


@functools.partial(jax.jit, static_argnames=("block_b", "compute_dtype"))
def policy_forward(state, w1, b1, w2, b2, log_std, *, block_b=2048,
                   compute_dtype=None):
    """Pallas implementation of PolicyNetwork.forward (fixed_std=False branch).

    Args:
      state:   (B, state_dim) float32
      w1:      (state_dim, hidden) float32   (stored transposed vs. torch Linear)
      b1:      (hidden,) float32
      w2:      (hidden, action_dim) float32
      b2:      (action_dim,) float32
      log_std: (action_dim,) float32
      block_b: target batch tile size (rows per grid step; rounded to 128).
      compute_dtype: matmul operand dtype (None -> per-device default).
    Returns:
      mean (B, action_dim) float32, std (action_dim,) float32
    """
    B, S = state.shape
    H = w1.shape[1]
    A = w2.shape[1]

    if compute_dtype is None:
        compute_dtype = _default_compute_dtype()

    std = jnp.exp(log_std.reshape(-1).astype(jnp.float32))

    # Tiny-batch inference path: a 1-step Pallas launch on a handful of rows is
    # pure fixed overhead; XLA's fused fp32 path is as fast and avoids pad/slice.
    if B <= 64:
        mean = jnp.tanh(state @ w1 + b1.reshape(1, H)) @ w2 + b2.reshape(1, A)
        return mean.astype(jnp.float32), std

    # Lane-dense layout: batch lives on the 128-lane axis.  Pad batch to a
    # multiple of 128 lanes and tile it.
    LANES = 128
    Bp = _round_up(B, LANES)
    tb = min(_round_up(block_b, LANES), Bp)
    # v7x megacore: make sure the (parallel) batch grid has >= 2 steps so both
    # TensorCores get work when the batch is big enough to split.
    if Bp // tb < 2 and Bp >= 2 * LANES:
        tb = _round_up(Bp // 2, LANES)
    Bp = _round_up(Bp, tb)

    # state^T: (S, Bp).  Padded columns compute garbage in-kernel; sliced off
    # after the transpose back (never observed).
    xT = jnp.pad(state, ((0, Bp - B), (0, 0))).T.astype(compute_dtype)

    w1T = w1.T.astype(compute_dtype)              # (H, S)
    w2T = w2.T.astype(compute_dtype)              # (A, H)
    b1c = b1.reshape(H, 1).astype(jnp.float32)    # broadcast along lanes
    b2c = b2.reshape(A, 1).astype(jnp.float32)

    grid = (Bp // tb,)
    meanT = pl.pallas_call(
        _policy_mean_t_kernel,
        out_shape=jax.ShapeDtypeStruct((A, Bp), jnp.float32),
        grid_spec=pltpu.PrefetchScalarGridSpec(
            num_scalar_prefetch=0,
            grid=grid,
            in_specs=[
                # state^T tiled over the batch (lane) grid axis.
                pl.BlockSpec((S, tb), lambda i: (0, i)),
                # Weights / biases: constant index_map -> loaded once, resident.
                pl.BlockSpec((H, S), lambda i: (0, 0)),
                pl.BlockSpec((H, 1), lambda i: (0, 0)),
                pl.BlockSpec((A, H), lambda i: (0, 0)),
                pl.BlockSpec((A, 1), lambda i: (0, 0)),
            ],
            # Lane-dense output: last dim = batch tile (multiple of 128).
            out_specs=pl.BlockSpec((A, tb), lambda i: (0, i)),
        ),
        compiler_params=pltpu.CompilerParams(
            dimension_semantics=("parallel",),
        ),
    )(xT, w1T, b1c, w2T, b2c)

    mean = meanT.T[:B]                            # back to (B, A), drop padding
    return mean, std


def _init_params(key, state_dim, hidden, action_dim):
    """Deterministic PyTorch-Linear-style init (uniform +-1/sqrt(fan_in))."""
    k1, k2, k3, k4 = jax.random.split(key, 4)
    lim1 = 1.0 / jnp.sqrt(jnp.float32(state_dim))
    lim2 = 1.0 / jnp.sqrt(jnp.float32(hidden))
    w1 = jax.random.uniform(k1, (state_dim, hidden), jnp.float32, -lim1, lim1)
    b1 = jax.random.uniform(k2, (hidden,), jnp.float32, -lim1, lim1)
    w2 = jax.random.uniform(k3, (hidden, action_dim), jnp.float32, -lim2, lim2)
    b2 = jax.random.uniform(k4, (action_dim,), jnp.float32, -lim2, lim2)
    # PolicyNetwork.__init__: log_std = ones(action_dim) (learnable, not fixed)
    log_std = jnp.ones((action_dim,), jnp.float32)
    return w1, b1, w2, b2, log_std


def _reference_mean(state, w1, b1, w2, b2, compute_dtype):
    """Plain-JAX reference with matching operand dtype / fp32 accumulation."""
    xc = state.astype(compute_dtype)
    h = jnp.tanh(
        jnp.dot(xc, w1.astype(compute_dtype), preferred_element_type=jnp.float32)
        + b1.reshape(1, -1)
    )
    return (
        jnp.dot(h.astype(compute_dtype), w2.astype(compute_dtype),
                preferred_element_type=jnp.float32)
        + b2.reshape(1, -1)
    )


if __name__ == "__main__":
    STATE_DIM, HIDDEN, ACTION_DIM = 16, 32, 8

    key = jax.random.PRNGKey(0)
    k_state, k_params = jax.random.split(key)
    w1, b1, w2, b2, log_std = _init_params(k_params, STATE_DIM, HIDDEN, ACTION_DIM)

    compute_dtype = _default_compute_dtype()

    # --- Batched case: exercises the lane-dense gridded kernel.
    #     B=512 -> Bp=512, tb=256 -> 2 parallel grid steps (v7x-friendly). ---
    B = 512
    state = jax.random.normal(k_state, (B, STATE_DIM), jnp.float32)
    mean, std = policy_forward(state, w1, b1, w2, b2, log_std,
                               compute_dtype=compute_dtype)
    jax.block_until_ready((mean, std))

    mean_ref_cd = _reference_mean(state, w1, b1, w2, b2, compute_dtype)
    mean_ref_f32 = (jnp.tanh(state @ w1 + b1.reshape(1, -1)) @ w2
                    + b2.reshape(1, -1))
    std_ref = jnp.exp(log_std)

    assert mean.shape == (B, ACTION_DIM) and std.shape == (ACTION_DIM,)
    assert jnp.allclose(mean, mean_ref_cd, atol=2e-3, rtol=2e-3)
    assert jnp.allclose(mean, mean_ref_f32, atol=5e-2, rtol=5e-2)  # dtype sanity
    assert jnp.allclose(std, std_ref, atol=1e-6, rtol=1e-6)

    # --- Tiny-batch case: exercises the small-B fast path (no Pallas launch). ---
    state_small = state[:2]
    mean_s, std_s = policy_forward(state_small, w1, b1, w2, b2, log_std,
                                   compute_dtype=compute_dtype)
    jax.block_until_ready((mean_s, std_s))
    assert mean_s.shape == (2, ACTION_DIM)
    assert jnp.allclose(mean_s, mean_ref_f32[:2], atol=5e-2, rtol=5e-2)
    assert jnp.allclose(std_s, std_ref, atol=1e-6, rtol=1e-6)

    print("KERNEL_OK")
</pallas_src>

<mosaic_0001>
module attributes {stable_mosaic.version = 11 : i64} {
  func.func @_policy_mean_t_kernel(%arg0: i32, %arg1: memref<16x256xbf16, #tpu.memory_space<vmem>>, %arg2: memref<32x16xbf16, #tpu.memory_space<vmem>>, %arg3: memref<32x1xf32, #tpu.memory_space<vmem>>, %arg4: memref<8x32xbf16, #tpu.memory_space<vmem>>, %arg5: memref<8x1xf32, #tpu.memory_space<vmem>>, %arg6: memref<8x256xf32, #tpu.memory_space<vmem>>) attributes {dimension_semantics = [#tpu.dimension_semantics<parallel>], iteration_bounds = array<i64: 2>, scalar_prefetch = 0 : i64, scratch_operands = 0 : i64, tpu.core_type = #tpu.core_type<tc>, window_params = [{transform_indices = @transform_0, window_bounds = array<i64: 16, 256>}, {pipeline_mode = #tpu.pipeline_mode<synchronous>, transform_indices = @transform_1, window_bounds = array<i64: 32, 16>}, {pipeline_mode = #tpu.pipeline_mode<synchronous>, transform_indices = @transform_2, window_bounds = array<i64: 32, 1>}, {pipeline_mode = #tpu.pipeline_mode<synchronous>, transform_indices = @transform_3, window_bounds = array<i64: 8, 32>}, {pipeline_mode = #tpu.pipeline_mode<synchronous>, transform_indices = @transform_4, window_bounds = array<i64: 8, 1>}, {transform_indices = @transform_5, window_bounds = array<i64: 8, 256>}]} {
    %c0 = arith.constant 0 : index
    %c0_0 = arith.constant 0 : index
    %0 = vector.load %arg2[%c0, %c0_0] : memref<32x16xbf16, #tpu.memory_space<vmem>>, vector<32x16xbf16>
    %c0_1 = arith.constant 0 : index
    %c0_2 = arith.constant 0 : index
    %1 = vector.load %arg1[%c0_1, %c0_2] : memref<16x256xbf16, #tpu.memory_space<vmem>>, vector<16x256xbf16>
    %cst = arith.constant dense<0.000000e+00> : vector<32x256xf32>
    %2 = tpu.matmul %0, %1, %cst {dimension_numbers = #tpu.dot_dimension_numbers<[1], [0], [0], [1], [0, 0, 1, 1], [], []>} : vector<32x16xbf16>, vector<16x256xbf16>, vector<32x256xf32> -> vector<32x256xf32>
    %c0_3 = arith.constant 0 : index
    %c0_4 = arith.constant 0 : index
    %3 = vector.load %arg3[%c0_3, %c0_4] : memref<32x1xf32, #tpu.memory_space<vmem>>, vector<32x1xf32>
    %4 = vector.broadcast %3 : vector<32x1xf32> to vector<32x256xf32>
    %5 = arith.addf %2, %4 : vector<32x256xf32>
    %6 = math.tanh %5 : vector<32x256xf32>
    %c0_5 = arith.constant 0 : index
    %c0_6 = arith.constant 0 : index
    %7 = vector.load %arg4[%c0_5, %c0_6] : memref<8x32xbf16, #tpu.memory_space<vmem>>, vector<8x32xbf16>
    %8 = arith.truncf %6 : vector<32x256xf32> to vector<32x256xbf16>
    %cst_7 = arith.constant dense<0.000000e+00> : vector<8x256xf32>
    %9 = tpu.matmul %7, %8, %cst_7 {dimension_numbers = #tpu.dot_dimension_numbers<[1], [0], [0], [1], [0, 0, 1, 1], [], []>} : vector<8x32xbf16>, vector<32x256xbf16>, vector<8x256xf32> -> vector<8x256xf32>
    %c0_8 = arith.constant 0 : index
    %c0_9 = arith.constant 0 : index
    %10 = vector.load %arg5[%c0_8, %c0_9] : memref<8x1xf32, #tpu.memory_space<vmem>>, vector<8x1xf32>
    %11 = vector.broadcast %10 : vector<8x1xf32> to vector<8x256xf32>
    %12 = arith.addf %9, %11 : vector<8x256xf32>
    %c0_10 = arith.constant 0 : index
    %c0_11 = arith.constant 0 : index
    %13 = vector.load %arg6[%c0_10, %c0_11] : memref<8x256xf32, #tpu.memory_space<vmem>>, vector<8x256xf32>
    tpu.vector_store %arg6[%c0_10, %c0_11], %12 {strides = array<i32>} : memref<8x256xf32, #tpu.memory_space<vmem>>, vector<8x256xf32>,
    return
  }
  func.func @transform_0(%arg0: i32) -> (i32, i32) {
    %c0_i32 = arith.constant 0 : i32
    %c0_i32_0 = arith.constant 0 : i32
    return %c0_i32, %arg0 : i32, i32
  }
  func.func @transform_1(%arg0: i32) -> (i32, i32) {
    %c0_i32 = arith.constant 0 : i32
    %c0_i32_0 = arith.constant 0 : i32
    %c0_i32_1 = arith.constant 0 : i32
    return %c0_i32, %c0_i32_0 : i32, i32
  }
  func.func @transform_2(%arg0: i32) -> (i32, i32) {
    %c0_i32 = arith.constant 0 : i32
    %c0_i32_0 = arith.constant 0 : i32
    %c0_i32_1 = arith.constant 0 : i32
    return %c0_i32, %c0_i32_0 : i32, i32
  }
  func.func @transform_3(%arg0: i32) -> (i32, i32) {
    %c0_i32 = arith.constant 0 : i32
    %c0_i32_0 = arith.constant 0 : i32
    %c0_i32_1 = arith.constant 0 : i32
    return %c0_i32, %c0_i32_0 : i32, i32
  }
  func.func @transform_4(%arg0: i32) -> (i32, i32) {
    %c0_i32 = arith.constant 0 : i32
    %c0_i32_0 = arith.constant 0 : i32
    %c0_i32_1 = arith.constant 0 : i32
    return %c0_i32, %c0_i32_0 : i32, i32
  }
  func.func @transform_5(%arg0: i32) -> (i32, i32) {
    %c0_i32 = arith.constant 0 : i32
    %c0_i32_0 = arith.constant 0 : i32
    return %c0_i32, %arg0 : i32, i32
  }
}

</mosaic_0001>

<bundles_post_ra>
// kernel: policy_forward.1
= control target key start
LH: loop header
LB: loop body
LE: loop exit
PB: predicated region body
PF: predicated region fallthrough
CT: control target
= control target key end

     0   :  { %10 = vsyncpa [#allocation4], 0  ;;  %s840_s0 = inlined_call_operand.vmem [shape: bf16[16,512], index: 0, kind: input, shape index: {}]   ;;  %s841_s1 = inlined_call_operand.vmem [shape: bf16[32,16], index: 1, kind: input, shape index: {}]   ;;  %s842_s2 = inlined_call_operand.vmem [shape: f32[32,1], index: 2, kind: input, shape index: {}]   ;;  %s843_s3 = inlined_call_operand.vmem [shape: bf16[8,32], index: 3, kind: input, shape index: {}]   ;;  %s844_s4 = inlined_call_operand.vmem [shape: f32[8,1], index: 4, kind: input, shape index: {}]   ;;  %s845_s5 = inlined_call_operand.hbm [shape: f32[8,512], index: 5, kind: output, shape index: {}]  }
   0x1   :  { %12 = vsyncpa [#allocation4 + $0x1], 0  ;;  %s703_s18 = smov 0   ;;  %s705_s19 = smov 0  }
   0x2   :  { %s707_s20 = smov 0   ;;  %s709_s21 = smov 0  }
   0x3 LB: > { %s520_s22 = sadd.s32 4294967295, %s669_s21   ;;  %s521_s23 = sadd.s32 4294967294, %s669_s21   ;;  %s669_s21 = sphi %s709_s21, %s851_s21   ;;  %s665_s20 = sphi %s707_s20, %s850_s20   ;;  %s661_s19 = sphi %s705_s19, %s849_s19   ;;  %s657_s18 = sphi %s703_s18, %s848_s18  }
   0x4   : > { %s726_s24 = sadd.s32 1, %s669_s21   ;;  %s25_s25 = sadd.s32 1, %s665_s20 }
   0x5   : > { %s22_s26 = ssub.s32 %s669_s21, %s726_s24  ;;  %p32_p0 = scmp.ne.s32.totalorder %s665_s20, %s661_s19 }
   0x6   : > { %p23_p1 = scmp.eq.s32.totalorder %s22_s26, 0  ;;  %p33_p2 = scmp.eq.s32.totalorder %s669_s21, 0 }
   0x7   : > { %p146_p3 = scmp.eq.s32.totalorder %s520_s22, 1  ;;  %p151_p4 = scmp.ne.s32.totalorder %s661_s19, %s657_s18 }
   0x8   : > { %s739_s27 = scalar_select %p23_p1, %s665_s20, %s25_s25  }
   0x9   : > { %p34_p5 = por %p33_p2, %p32_p0  ;;  %p741_p6 = por %p146_p3, %p32_p0 }
   0xa   : > { %p152_p7 = scmp.eq.s32.totalorder %s521_s23, 1  ;;  %p523_p9 = scmp.ge.s32.totalorder %s669_s21, 2 }
   0xc   : > { %p745_p8 = por %p152_p7, %p151_p4  ;;  %180 = sbr.rel (%p523_p9) target bundleno = 26 (0x1a), region = 32 }
  0x13   : > { %183 = sbr.rel (!%p34_p5) target bundleno = 26 (0x1a), region = 36  ;;  %s185_s30 = sand.u32 (%p34_p5), 1, %s665_s20  }
  0x14   : > { %s542_s6 = sshll.u32 (%p34_p5), %s669_s21, 3  ;;  %s524_s7 = sshll.u32 (%p34_p5), %s185_s30, 4 }
  0x15   : > { %s190_s10 = scalar_lea.vmem (%p34_p5), %s840_s0, %s542_s6  ;;  %s187_s11 = scalar_lea.vmem (%p34_p5), [#allocation2], %s524_s7 }
  0x16   : > { %v220_v0 = vld [vmem:[%s190_s10] sm:$0xff] (%p34_p5)  ;;  %v222_v1 = vld [vmem:[%s190_s10 + $0x10] sm:$0xff] (%p34_p5) }
  0x17   : > { %221 = vst [vmem:[%s187_s11] sm:$0xff] (%p34_p5), %v220_v0  ;;  %223 = vst [vmem:[%s187_s11 + $0x8] sm:$0xff] (%p34_p5), %v222_v1 }
  0x1a PF: > { %p527_p10 = scmp.ge.s32.totalorder %s669_s21, 1  ;;  %p228_p11 = scmp.lt.s32.totalorder %s669_s21, 3 }
  0x1c   : > { %p229_p12 = pnand %p527_p10, %p228_p11 }
  0x1d   : > { %s235_s12 = sand.u32 (!%p229_p12), 1, %s661_s19   ;;  %v671_v2 = vmov (!%p229_p12), 0   ;;  %v271_v3 = vld [vmem:[%s842_s2] sm:$0xff] (!%p229_p12)  ;;  %v272_v6 = vld [vmem:[%s842_s2 + $0x8] sm:$0xff] (!%p229_p12)  ;;  %v273_v7 = vld [vmem:[%s842_s2 + $0x10] sm:$0xff] (!%p229_p12)  ;;  %vm315_vm0 = vcmask (!%p229_p12), 130048  }
  0x1e   : > { %232 = sbr.rel (%p229_p12) target bundleno = 508 (0x1fc), region = 74  ;;  %s762_s13 = sshll.u32 (!%p229_p12), %s235_s12, 4  ;;  %354 = vmatprep.mubr.bf16.mxu0 (!%p229_p12), %v671_v2  ;;  %584 = vset.pattern.permute.xlu0 (!%p229_p12), %v671_v2  ;;  %v589_v8 = vld [vmem:[%s841_s1] sm:$0xff] (!%p229_p12)   ;;  %v274_v9 = vld [vmem:[%s842_s2 + $0x18] sm:$0xff] (!%p229_p12)  ;;  %v590_v11 = vld [vmem:[%s841_s1 + $0x8] sm:$0xff] (!%p229_p12)   ;;  %vm394_vm1 = vcmask (!%p229_p12), 261120  }
  0x1f   : > { %585 = vset.pattern.permute.xlu1 (!%p229_p12), %v671_v2  ;;  %430 = vmatprep.mubr.bf16.mxu1 (!%p229_p12), %v671_v2  ;;  %s237_s16 = scalar_lea.vmem (!%p229_p12), [#allocation2], %s762_s13  ;;  %v388_v10 = vld [vmem:[%s844_s4] sm:$0xff] (!%p229_p12)  ;;  %s543_s17 = sshll.u32 (!%p229_p12), %s520_s22, 8 }
  0x20   : > { %v586_v4 = vld [vmem:[%s237_s16 + $0x4] ss:$8 sps:$4 sm:$0xff] (!%p229_p12)   ;;  %277 = vperm.xlu0 (!%p229_p12), %584, %v271_v3   ;;  %v588_v5 = vld [vmem:[%s237_s16] ss:$8 sps:$4 sm:$0xff] (!%p229_p12)   ;;  %287 = vperm.xlu1 (!%p229_p12), %585, %v273_v7   ;;  %s261_s23 = scalar_lea.vmem (!%p229_p12), [#allocation3], %s762_s13  ;;  %s795_s6 = scalar_lea.hbm (!%p229_p12), %s845_s5, %s543_s17 }
  0x21   : > { %322 = vmatprep.subr.bf16.mxu0 (!%p229_p12), %v586_v4  ;;  %v383_v44 = vld [vmem:[%s843_s3] sm:$0xf] (!%p229_p12)  ;;  %s456_s25 = sshll.u32 (!%p229_p12), %s261_s23, 4  ;;  %s442_s22 = scalar_lea.sflag (!%p229_p12), [#allocation4], %s235_s12  ;;  %s797_s25 = int_to_ptr.vmem [resolvable:$true] %s456_s25 }
  0x22   : > { %323 = vmatpush1.bf16.msra.mxu0 (!%p229_p12), %v588_v5  ;;  %s607_s13 = scalar_lea.vmem (!%p229_p12), %s797_s25, 256  ;;  %s672_s7 = smov (!%p229_p12), [#allocation3]  }
  0x23   : > { %p608_p13 = scmp.ne.s32.totalorder (!%p229_p12), %s797_s25, %s607_s13  ;;  %s611_s8 = sshll.u32 (!%p229_p12), %s672_s7, 4  ;;  %s612_s8 = int_to_ptr.vmem [resolvable:$false] %s611_s8 }
  0x24   : > { %282 = vperm.xlu0 (!%p229_p12), %584, %v272_v6   ;;  %292 = vperm.xlu1 (!%p229_p12), %585, %v274_v9   ;;  %s613_s9 = scalar_lea.vmem (!%p229_p12), %s612_s8, 512  ;;  %p614_p2 = scmp.lt.s32.totalorder (!%p229_p12), %s797_s25, %s612_s8 }
  0x25   : > { %534 = vmatmul.mubr.msk.bf16.vlgmr.msra.gmra.mrb[0].mxu0 %vm315_vm0, %v589_v8  ;;  %p609_p0 = pnand %p608_p13, %p741_p6  ;;  %p615_p3 = scmp.lt.s32.totalorder %s613_s9, %s607_s13 }
  0x26   : > { %364 = vmatprep.mubr.bf16.mxu0 %v671_v2 }
  0x27   : > { %p610_p1 = pneg %p609_p0  ;;  %p616_p4 = por %p615_p3, %p614_p2 }
  0x28   : > { %391 = vperm.xlu0 %584, %v388_v10  }
  0x29   : > { %p617_p5 = pnand %p616_p4, %p610_p1 }
  0x2d   : > { %535 = vmatmul.mubr.msk.bf16.gmra.mrb[4].mxu0 %vm315_vm0, %v590_v11 }
  0x9f   : > { %v278_v12 = vpop.permute.xlu0 %277  ;;  %v288_v21 = vpop.permute.xlu1 %287 }
  0xa3   : > { %v283_v16 = vpop.permute.xlu0 %282  ;;  %v293_v26 = vpop.permute.xlu1 %292 }
  0xa7   : > { %v392_v45 = vpop.permute.xlu0 %391 }
  0xf8   : > { %v356_v13 = vpop.f32.mrb[0].mxu0 }
  0xf9   : > { %v357_v14 = vadd.f32 %v356_v13, %v278_v12  ;;  %v358_v15 = vpop.f32.mrb[1].mxu0 }
  0xfa   : > { %v359_v17 = vadd.f32 %v358_v15, %v278_v12  ;;  %v360_v18 = vpop.f32.mrb[2].mxu0 }
  0xfb   : > { %591 = vtanh.f32 %v357_v14  ;;  %v361_v19 = vadd.f32 %v360_v18, %v283_v16  ;;  %v362_v20 = vpop.f32.mrb[3].mxu0 }
  0xfc   : > { %593 = vtanh.f32 %v359_v17  ;;  %v363_v22 = vadd.f32 %v362_v20, %v283_v16 }
  0xfd   : > { %595 = vtanh.f32 %v361_v19 }
  0xfe   : > { %597 = vtanh.f32 %v363_v22 }
 0x100   : > { %v366_v23 = vpop.f32.mrb[4].mxu0 }
 0x101   : > { %v367_v24 = vadd.f32 %v366_v23, %v288_v21  ;;  %v368_v25 = vpop.f32.mrb[5].mxu0 }
 0x102   : > { %v369_v27 = vadd.f32 %v368_v25, %v288_v21  ;;  %v370_v28 = vpop.f32.mrb[6].mxu0 }
 0x103   : > { %599 = vtanh.f32 %v367_v24  ;;  %v371_v29 = vadd.f32 %v370_v28, %v293_v26  ;;  %v372_v30 = vpop.f32.mrb[7].mxu0 }
 0x104   : > { %601 = vtanh.f32 %v369_v27  ;;  %v373_v31 = vadd.f32 %v372_v30, %v293_v26 }
 0x105   : > { %v592_v32 = vpop.eup %591  ;;  %603 = vtanh.f32 %v371_v29 }
 0x106   : > { %v594_v33 = vpop.eup %593  ;;  %605 = vtanh.f32 %v373_v31 }
 0x107   : > { %v596_v34 = vpop.eup %595 }
 0x108   : > { %v598_v35 = vpop.eup %597  ;;  %v384_v36 = vpack.c.bf16 %v596_v34, %v592_v32 }
 0x109   : > { %v385_v37 = vpack.c.bf16 %v598_v35, %v594_v33 }
 0x10b   : > { %398 = vmatprep.subr.bf16.mxu1 %v385_v37 }
 0x10c   : > { %399 = vmatpush1.bf16.msra.mxu1 %v384_v36 }
 0x10d   : > { %v600_v38 = vpop.eup %599 }
 0x10e   : > { %v602_v39 = vpop.eup %601 }
 0x10f   : > { %v604_v40 = vpop.eup %603 }
 0x110   : > { %v606_v41 = vpop.eup %605  ;;  %v386_v42 = vpack.c.bf16 %v604_v40, %v600_v38 }
 0x111   : > { %v387_v43 = vpack.c.bf16 %v606_v41, %v602_v39 }
 0x113   : > { %400 = vmatprep.subr.bf16.mxu1 %v387_v43 }
 0x114   : > { %401 = vmatpush1.bf16.msra.mxu1 %v386_v42 }
 0x117   : > { %536 = vmatmul.mubr.msk.bf16.vlgmr.msra.gmra.mrb[0].mxu1 %vm394_vm1, %v383_v44 }
 0x1ea   : > { %v432_v46 = vpop.f32.mrb[0].mxu1 }
 0x1eb   : > { %v433_v47 = vadd.f32 %v432_v46, %v392_v45  ;;  %v434_v48 = vpop.f32.mrb[1].mxu1 }
 0x1ec   : > { %v435_v49 = vadd.f32 %v434_v48, %v392_v45  ;;  %v436_v50 = vpop.f32.mrb[2].mxu1 }
 0x1ed   : > { %439 = vst [vmem:[%s261_s23] sm:$0xff] %v433_v47  ;;  %v437_v51 = vpop.f32.mrb[3].mxu1 }
 0x1ee   : > { %440 = vst [vmem:[%s261_s23 + $0x8] sm:$0xff] %v435_v49 }
 0x1ef   : > { %620 = shalt.err (!%p617_p5)
}
 0x1f0   : > { %s621_s12 = scalar_lea.hbm %s795_s6, 256  ;;  %s625_s14 = scalar_lea.hbm %s845_s5, 512 }
 0x1f1   : > { %p622_p7 = scmp.ne.s32.totalorder %s795_s6, %s621_s12  ;;  %p626_p12 = scmp.lt.u32.totalorder %s795_s6, %s845_s5 }
 0x1f2   : > { %p627_p13 = scmp.lt.u32.totalorder %s625_s14, %s621_s12  ;;  %p629_p1 = scmp.lt.u32.totalorder %s621_s12, %s795_s6 }
 0x1f3   : > { %p623_p10 = pnand %p622_p7, %p741_p6 }
 0x1f4   : > { %p628_p0 = por %p627_p13, %p626_p12 }
 0x1f5   : > { %p624_p11 = pneg %p623_p10 }
 0x1f6   : > { %p630_p2 = por %p629_p1, %p628_p0 }
 0x1f8   : > { %p631_p3 = pnand %p630_p2, %p624_p11 }
 0x1fa   : > { %634 = shalt.err (!%p631_p3)
}
 0x1fb   : > { %544 = dma.vmem_to_hbm [thread:$0]  (%p741_p6), %s797_s25, 256, %s795_s6, %s442_s22  }
 0x1fc PF: > { %s468_s17 = sand.u32 1, %s657_s18   ;;  %p547_p4 = pnand %p523_p9, %p745_p8 }
 0x1fd   : > { %s469_s23 = scalar_lea.sflag [#allocation4], %s468_s17 }
 0x1fe   : > { %652 = dma.done.wait (!%p547_p4), %s469_s23, 256  }
 0x1ff   : > { %654 = vsyncadd (!%p547_p4), %s469_s23, 4294967040  ;;  %p15_p5 = scmp.ge.s32.totalorder %s726_s24, 4   ;;  %s848_s18 = smov %s661_s19 }
 0x200   : > { %s849_s19 = smov %s665_s20  ;;  %s850_s20 = smov %s739_s27 }
 0x201   : > { %s851_s21 = smov %s726_s24  ;;  %17 = sbr.rel (!%p15_p5) target bundleno = 3 (0x3), region = 118 }
 0x208   :  { %474 = vsyncpa [#allocation4], 1 }
 0x209   :  { %476 = vsyncpa [#allocation4 + $0x1], 1 }

</bundles_post_ra>
